<compile_context>
chip_gen: v6e
topology: v6e:2x2x1
jax: 0.10.0
libtpu: 0.0.40
codegen_flags: <defaults>
</compile_context>

<pallas_src>
import jax
import jax.numpy as jnp
from jax.experimental import pallas as pl
from jax.experimental.pallas import tpu as pltpu  # noqa: F401  (TPU lowering)

IMG_DIM = 28 * 28        # 784
IMG_DIM_PAD = 896        # 7 * 128: lane-dense padded output width
NUM_HIDDEN = 128
Z_DIM = 64
BN_EPS = 1e-5
LEAKY_SLOPE = 0.2


def generator_kernel(x_ref, w1_ref, gamma_ref, beta_ref, w2_ref, b2_ref, o_ref):
    # ---- Linear 1: (B, Z) @ (Z, H).  b1 is omitted: training-mode BatchNorm
    #      subtracts the batch mean, which cancels any additive bias exactly.
    x = x_ref[...]                                               # (B, Z)
    h = jnp.dot(x, w1_ref[...], preferred_element_type=jnp.float32)  # (B, H)

    # ---- BatchNorm1d (training mode, biased batch stats), folded into a
    #      single per-feature scale/shift computed at (1, H) width.
    mean = jnp.mean(h, axis=0, keepdims=True)                    # (1, H)
    var = jnp.mean((h - mean) * (h - mean), axis=0, keepdims=True)
    scale = gamma_ref[...] * jax.lax.rsqrt(var + BN_EPS)         # (1, H)
    shift = beta_ref[...] - mean * scale                         # (1, H)
    h_bn = h * scale + shift                                     # (B, H)

    # ---- LeakyReLU(0.2): max(h, 0.2*h) (valid for slope < 1) ----
    a = jnp.maximum(h_bn, LEAKY_SLOPE * h_bn)

    # ---- Linear 2: (B, H) @ (H, D_pad) + (1, D_pad) ----
    y = jnp.dot(a, w2_ref[...], preferred_element_type=jnp.float32)
    y = y + b2_ref[...]                                          # (B, D_pad)

    # ---- Sigmoid via EUP tanh: sigmoid(y) = 0.5 * tanh(0.5*y) + 0.5 ----
    o_ref[...] = 0.5 * jnp.tanh(0.5 * y) + 0.5


def generator_forward(x, params):
    """x: (B, Z_DIM) float32 -> (B, IMG_DIM) float32."""
    w1, _b1, gamma, beta, w2, b2 = params    # b1 intentionally unused (see kernel)
    B = x.shape[0]

    # Pad the output feature dim to a multiple of 128 lanes (zero columns give
    # sigmoid(0)=0.5 in the pad region, which is sliced away below).
    pad = IMG_DIM_PAD - w2.shape[1]
    w2_p = jnp.pad(w2, ((0, 0), (0, pad)))
    b2_p = jnp.pad(b2, ((0, 0), (0, pad)))

    full = lambda shape: pl.BlockSpec(shape, lambda: tuple(0 for _ in shape))

    out_padded = pl.pallas_call(
        generator_kernel,
        out_shape=jax.ShapeDtypeStruct((B, IMG_DIM_PAD), jnp.float32),
        in_specs=[
            full(x.shape),        # x      (B, Z)
            full(w1.shape),       # W1     (Z, H)
            full(gamma.shape),    # gamma  (1, H)
            full(beta.shape),     # beta   (1, H)
            full(w2_p.shape),     # W2     (H, D_pad)
            full(b2_p.shape),     # b2     (1, D_pad)
        ],
        out_specs=full((B, IMG_DIM_PAD)),
    )(x, w1, gamma, beta, w2_p, b2_p)

    # TODO(synk): for large batches, tile the batch dim over a grid with
    # dimension_semantics=('parallel',) and a two-pass BatchNorm so the work
    # shards across v7x's two TensorCores and stays within its 64 MiB VMEM.
    return out_padded[:, :IMG_DIM]


def init_params(key):
    """Deterministic parameter init matching the PyTorch module's shapes.

    Linear weights: xavier_uniform_ (gain=1), biases filled with 0.
    BatchNorm1d: gamma=1, beta=0.
    Weights are stored as (in_features, out_features).
    """
    k1, k2 = jax.random.split(key, 2)

    def xavier_uniform(k, fan_in, fan_out):
        limit = jnp.sqrt(6.0 / (fan_in + fan_out))
        # PyTorch weight is (out, in); we store the transpose (in, out).
        return jax.random.uniform(k, (fan_in, fan_out), jnp.float32,
                                  minval=-limit, maxval=limit)

    w1 = xavier_uniform(k1, Z_DIM, NUM_HIDDEN)           # (64, 128)
    b1 = jnp.zeros((1, NUM_HIDDEN), jnp.float32)
    gamma = jnp.ones((1, NUM_HIDDEN), jnp.float32)
    beta = jnp.zeros((1, NUM_HIDDEN), jnp.float32)
    w2 = xavier_uniform(k2, NUM_HIDDEN, IMG_DIM)         # (128, 784)
    b2 = jnp.zeros((1, IMG_DIM), jnp.float32)
    return (w1, b1, gamma, beta, w2, b2)


def generator_ref(x, params):
    """Pure-JAX reference matching the PyTorch forward (training-mode BN)."""
    w1, b1, gamma, beta, w2, b2 = params
    h = x @ w1 + b1
    mean = jnp.mean(h, axis=0, keepdims=True)
    var = jnp.mean((h - mean) ** 2, axis=0, keepdims=True)
    h = (h - mean) / jnp.sqrt(var + BN_EPS) * gamma + beta
    a = jnp.where(h >= 0, h, LEAKY_SLOPE * h)
    y = a @ w2 + b2
    return jax.nn.sigmoid(y)


if __name__ == "__main__":
    key = jax.random.PRNGKey(0)
    k_params, k_x = jax.random.split(key)

    params = init_params(k_params)
    batch = 8
    x = jax.random.normal(k_x, (batch, Z_DIM), jnp.float32)

    out = generator_forward(x, params)
    out = jax.block_until_ready(out)

    ref = generator_ref(x, params)
    assert out.shape == (batch, IMG_DIM), out.shape
    assert jnp.allclose(out, ref, atol=1e-5, rtol=1e-5), float(
        jnp.max(jnp.abs(out - ref)))

    print("KERNEL_OK")
</pallas_src>

<mosaic_0001>
module attributes {stable_mosaic.version = 11 : i64} {
  func.func @generator_kernel(%arg0: memref<8x64xf32, #tpu.memory_space<vmem>>, %arg1: memref<64x128xf32, #tpu.memory_space<vmem>>, %arg2: memref<1x128xf32, #tpu.memory_space<vmem>>, %arg3: memref<1x128xf32, #tpu.memory_space<vmem>>, %arg4: memref<128x896xf32, #tpu.memory_space<vmem>>, %arg5: memref<1x896xf32, #tpu.memory_space<vmem>>, %arg6: memref<8x896xf32, #tpu.memory_space<vmem>>) attributes {dimension_semantics = [], scalar_prefetch = 0 : i64, scratch_operands = 0 : i64, tpu.core_type = #tpu.core_type<tc>} {
    %c0 = arith.constant 0 : index
    %c0_0 = arith.constant 0 : index
    %0 = vector.load %arg0[%c0, %c0_0] : memref<8x64xf32, #tpu.memory_space<vmem>>, vector<8x64xf32>
    %c0_1 = arith.constant 0 : index
    %c0_2 = arith.constant 0 : index
    %1 = vector.load %arg1[%c0_1, %c0_2] : memref<64x128xf32, #tpu.memory_space<vmem>>, vector<64x128xf32>
    %cst = arith.constant dense<0.000000e+00> : vector<8x128xf32>
    %2 = tpu.matmul %0, %1, %cst {dimension_numbers = #tpu.dot_dimension_numbers<[1], [0], [0], [1], [0, 0, 1, 1], [], []>} : vector<8x64xf32>, vector<64x128xf32>, vector<8x128xf32> -> vector<8x128xf32>
    %cst_3 = arith.constant dense<0.000000e+00> : vector<128xf32>
    %3 = vector.multi_reduction <add>, %2, %cst_3 [0] : vector<8x128xf32> to vector<128xf32>
    %4 = vector.shape_cast %3 : vector<128xf32> to vector<1x128xf32>
    %cst_4 = arith.constant 8.000000e+00 : f32
    %5 = vector.broadcast %cst_4 : f32 to vector<1x128xf32>
    %6 = arith.divf %4, %5 : vector<1x128xf32>
    %7 = vector.broadcast %6 : vector<1x128xf32> to vector<8x128xf32>
    %8 = arith.subf %2, %7 : vector<8x128xf32>
    %9 = vector.broadcast %6 : vector<1x128xf32> to vector<8x128xf32>
    %10 = arith.subf %2, %9 : vector<8x128xf32>
    %11 = arith.mulf %8, %10 : vector<8x128xf32>
    %cst_5 = arith.constant dense<0.000000e+00> : vector<128xf32>
    %12 = vector.multi_reduction <add>, %11, %cst_5 [0] : vector<8x128xf32> to vector<128xf32>
    %13 = vector.shape_cast %12 : vector<128xf32> to vector<1x128xf32>
    %cst_6 = arith.constant 8.000000e+00 : f32
    %14 = vector.broadcast %cst_6 : f32 to vector<1x128xf32>
    %15 = arith.divf %13, %14 : vector<1x128xf32>
    %c0_7 = arith.constant 0 : index
    %c0_8 = arith.constant 0 : index
    %16 = vector.load %arg2[%c0_7, %c0_8] : memref<1x128xf32, #tpu.memory_space<vmem>>, vector<1x128xf32>
    %cst_9 = arith.constant 9.99999974E-6 : f32
    %17 = vector.broadcast %cst_9 : f32 to vector<1x128xf32>
    %18 = arith.addf %15, %17 : vector<1x128xf32>
    %19 = math.rsqrt %18 : vector<1x128xf32>
    %20 = arith.mulf %16, %19 : vector<1x128xf32>
    %c0_10 = arith.constant 0 : index
    %c0_11 = arith.constant 0 : index
    %21 = vector.load %arg3[%c0_10, %c0_11] : memref<1x128xf32, #tpu.memory_space<vmem>>, vector<1x128xf32>
    %22 = arith.mulf %6, %20 : vector<1x128xf32>
    %23 = arith.subf %21, %22 : vector<1x128xf32>
    %24 = vector.broadcast %20 : vector<1x128xf32> to vector<8x128xf32>
    %25 = arith.mulf %2, %24 : vector<8x128xf32>
    %26 = vector.broadcast %23 : vector<1x128xf32> to vector<8x128xf32>
    %27 = arith.addf %25, %26 : vector<8x128xf32>
    %cst_12 = arith.constant 2.000000e-01 : f32
    %28 = vector.broadcast %cst_12 : f32 to vector<8x128xf32>
    %29 = arith.mulf %28, %27 : vector<8x128xf32>
    %30 = arith.maximumf %27, %29 : vector<8x128xf32>
    %c0_13 = arith.constant 0 : index
    %c0_14 = arith.constant 0 : index
    %31 = vector.load %arg4[%c0_13, %c0_14] : memref<128x896xf32, #tpu.memory_space<vmem>>, vector<128x896xf32>
    %cst_15 = arith.constant dense<0.000000e+00> : vector<8x896xf32>
    %32 = tpu.matmul %30, %31, %cst_15 {dimension_numbers = #tpu.dot_dimension_numbers<[1], [0], [0], [1], [0, 0, 1, 1], [], []>} : vector<8x128xf32>, vector<128x896xf32>, vector<8x896xf32> -> vector<8x896xf32>
    %c0_16 = arith.constant 0 : index
    %c0_17 = arith.constant 0 : index
    %33 = vector.load %arg5[%c0_16, %c0_17] : memref<1x896xf32, #tpu.memory_space<vmem>>, vector<1x896xf32>
    %34 = vector.broadcast %33 : vector<1x896xf32> to vector<8x896xf32>
    %35 = arith.addf %32, %34 : vector<8x896xf32>
    %cst_18 = arith.constant 5.000000e-01 : f32
    %36 = vector.broadcast %cst_18 : f32 to vector<8x896xf32>
    %37 = arith.mulf %36, %35 : vector<8x896xf32>
    %38 = math.tanh %37 : vector<8x896xf32>
    %cst_19 = arith.constant 5.000000e-01 : f32
    %39 = vector.broadcast %cst_19 : f32 to vector<8x896xf32>
    %40 = arith.mulf %39, %38 : vector<8x896xf32>
    %cst_20 = arith.constant 5.000000e-01 : f32
    %41 = vector.broadcast %cst_20 : f32 to vector<8x896xf32>
    %42 = arith.addf %40, %41 : vector<8x896xf32>
    %c0_21 = arith.constant 0 : index
    %c0_22 = arith.constant 0 : index
    %43 = vector.load %arg6[%c0_21, %c0_22] : memref<8x896xf32, #tpu.memory_space<vmem>>, vector<8x896xf32>
    tpu.vector_store %arg6[%c0_21, %c0_22], %42 {strides = array<i32>} : memref<8x896xf32, #tpu.memory_space<vmem>>, vector<8x896xf32>,
    return
  }
}

</mosaic_0001>

<bundles_post_ra>
// kernel: tpu_custom_call.1
= control target key start
LH: loop header
LB: loop body
LE: loop exit
PB: predicated region body
PF: predicated region fallthrough
CT: control target
= control target key end

     0   :  { %11 = vsyncpa [#allocation3], 0  ;;  %s979_s0 = inlined_call_operand.hbm [shape: f32[8,64], index: 0, kind: input, shape index: {}]   ;;  %s980_s1 = inlined_call_operand.hbm [shape: f32[64,128], index: 1, kind: input, shape index: {}]   ;;  %s981_s2 = inlined_call_operand.vmem [shape: f32[1,128], index: 2, kind: input, shape index: {}]   ;;  %s982_s3 = inlined_call_operand.vmem [shape: f32[1,128], index: 3, kind: input, shape index: {}]   ;;  %s983_s4 = inlined_call_operand.hbm [shape: f32[128,896], index: 4, kind: input, shape index: {}]   ;;  %s984_s5 = inlined_call_operand.vmem [shape: f32[1,896], index: 5, kind: input, shape index: {}]   ;;  %s985_s6 = inlined_call_operand.hbm [shape: f32[8,896], index: 6, kind: output, shape index: {}]  }
   0x1   :  { %12 = vsyncpa [#allocation6], 0 }
   0x2   :  { %13 = vsyncpa [#allocation4], 0  ;;  %s862_s21 = smov [#allocation5]  }
   0x3   :  { %s29_s22 = sshll.u32 %s862_s21, 4  ;;  %s30_s22 = int_to_ptr.vmem [resolvable:$true] %s29_s22 }
   0x4   :  { %s784_s23 = scalar_lea.vmem %s30_s22, 1024  ;;  %p789_p1 = scmp.lt.s32.totalorder %s30_s22, %s30_s22 }
   0x5   :  { %p785_p0 = scmp.ne.s32.totalorder %s30_s22, %s784_s23  ;;  %p790_p2 = scmp.lt.s32.totalorder %s784_s23, %s784_s23 }
   0x7   :  { %p791_p3 = por %p790_p2, %p789_p1 }
   0x9   :  { %p792_p4 = pnand %p791_p3, %p785_p0 }
   0xb   :  { %795 = shalt.err (!%p792_p4)
}
   0xc   :  { %s863_s24 = smov 128   ;;  %s864_s25 = smov 8  }
   0xd   :  { %35 = dma.hbm_to_vmem [thread:$0]  %s980_s1, 1024, %s30_s22, [#allocation6], %s863_s24, %s863_s24, %s864_s25  }
   0xe   :  { %s865_s28 = smov [#allocation2]   ;;  %s866_s30 = smov [#allocation7]  }
   0xf   :  { %s20_s29 = sshll.u32 %s865_s28, 4  ;;  %s45_s7 = sshll.u32 %s866_s30, 4  ;;  %s21_s29 = int_to_ptr.vmem [resolvable:$true] %s20_s29  ;;  %s46_s7 = int_to_ptr.vmem [resolvable:$true] %s45_s7 }
  0x10   :  { %s804_s8 = scalar_lea.vmem %s21_s29, 128  ;;  %p809_p6 = scmp.lt.s32.totalorder %s21_s29, %s21_s29 }
  0x11   :  { %p805_p5 = scmp.ne.s32.totalorder %s21_s29, %s804_s8  ;;  %p810_p7 = scmp.lt.s32.totalorder %s804_s8, %s804_s8 }
  0x13   :  { %p811_p8 = por %p810_p7, %p809_p6 }
  0x15   :  { %p812_p9 = pnand %p811_p8, %p805_p5 }
  0x17   :  { %815 = shalt.err (!%p812_p9)
}
  0x18   :  { %23 = dma.hbm_to_vmem [thread:$0]  %s979_s0, 128, %s21_s29, [#allocation3]  }
  0x19   :  { %s824_s11 = scalar_lea.vmem %s46_s7, 14336  ;;  %p829_p11 = scmp.lt.s32.totalorder %s46_s7, %s46_s7 }
  0x1a   :  { %p825_p10 = scmp.ne.s32.totalorder %s46_s7, %s824_s11  ;;  %p830_p12 = scmp.lt.s32.totalorder %s824_s11, %s824_s11 }
  0x1c   :  { %p831_p13 = por %p830_p12, %p829_p11 }
  0x1e   :  { %p832_p0 = pnand %p831_p13, %p825_p10 }
  0x20   :  { %835 = shalt.err (!%p832_p0)
}
  0x21   :  { %s867_s1 = smov 896   ;;  %s868_s12 = smov 56  }
  0x22   :  { %51 = dma.hbm_to_vmem [thread:$0]  %s983_s4, 14336, %s46_s7, [#allocation6], %s867_s1, %s867_s1, %s868_s12  }
  0x23   :  { %856 = dma.done.wait [#allocation3], 128  }
  0x24   :  { %857 = vsyncadd [#allocation3], 4294967168 }
  0x25   :  { %858 = dma.done.wait [#allocation6], 15360  }
  0x26   :  { %859 = vsyncadd [#allocation6], 4294951936  ;;  %v869_v0 = vmov 0.0   ;;  %vm870_vm0 = vmmov 0   ;;  %v71_v1 = vld [vmem:[#allocation5 + $0x38] sm:$0xff]  ;;  %v70_v2 = vld [vmem:[#allocation5 + $0x30] sm:$0xff] }
  0x27   :  { %696 = vmatprep.subr.mxu0 %v869_v0  ;;  %712 = vmatprep.mubr.msk.f32.mxu0 %vm870_vm0, %v869_v0  ;;  %v69_v3 = vld [vmem:[#allocation5 + $0x28] sm:$0xff]  ;;  %v68_v4 = vld [vmem:[#allocation5 + $0x20] sm:$0xff]  ;;  %v67_v5 = vld [vmem:[#allocation5 + $0x18] sm:$0xff]  ;;  %vm72_vm1 = vcmask 523264  }
  0x28   :  { %399 = vmatprep.mubr.f32.mxu1 %v869_v0  ;;  %697 = vmatpush3.msra.mxu0 %v71_v1  ;;  %v66_v6 = vld [vmem:[#allocation5 + $0x10] sm:$0xff]  ;;  %v65_v7 = vld [vmem:[#allocation5 + $0x8] sm:$0xff]  ;;  %v64_v8 = vld [vmem:[#allocation5] sm:$0xff] }
  0x29   :  { %698 = vmatprep.subr.mxu0 %v869_v0  ;;  %v63_v9 = vld [vmem:[#allocation2] sm:$0xff]  ;;  %v292_v10 = vld [vmem:[#allocation7 + $0x350] sm:$0xff]  ;;  %v294_v11 = vld [vmem:[#allocation7 + $0x360] sm:$0xff] }
  0x2a   :  { %699 = vmatpush3.msra.mxu0 %v70_v2  ;;  %335 = vmatprep.subr.mxu1 %v292_v10  ;;  %v291_v12 = vld [vmem:[#allocation7 + $0x348] sm:$0xff]  ;;  %v293_v13 = vld [vmem:[#allocation7 + $0x358] sm:$0xff]  ;;  %v284_v16 = vld [vmem:[#allocation7 + $0x310] sm:$0xff] }
  0x2b   :  { %700 = vmatprep.subr.mxu0 %v869_v0  ;;  %336 = vmatpush1.msra.mxu1 %v291_v12  ;;  %v285_v14 = vld [vmem:[#allocation7 + $0x318] sm:$0xff]  ;;  %v287_v15 = vld [vmem:[#allocation7 + $0x328] sm:$0xff]  ;;  %v286_v17 = vld [vmem:[#allocation7 + $0x320] sm:$0xff] }
  0x2c   :  { %701 = vmatpush3.msra.mxu0 %v69_v3  ;;  %337 = vmatprep.subr.mxu1 %v285_v14  ;;  %v278_v18 = vld [vmem:[#allocation7 + $0x2e0] sm:$0xff]  ;;  %v280_v19 = vld [vmem:[#allocation7 + $0x2f0] sm:$0xff]  ;;  %v277_v20 = vld [vmem:[#allocation7 + $0x2d8] sm:$0xff] }
  0x2d   :  { %702 = vmatprep.subr.mxu0 %v869_v0  ;;  %338 = vmatpush1.msra.mxu1 %v284_v16  ;;  %v279_v21 = vld [vmem:[#allocation7 + $0x2e8] sm:$0xff]  ;;  %v273_v23 = vld [vmem:[#allocation7 + $0x2b8] sm:$0xff]  ;;  %v270_v24 = vld [vmem:[#allocation7 + $0x2a0] sm:$0xff] }
  0x2e   :  { %703 = vmatpush3.msra.mxu0 %v68_v4  ;;  %339 = vmatprep.subr.mxu1 %v278_v18  ;;  %v271_v22 = vld [vmem:[#allocation7 + $0x2a8] sm:$0xff]  ;;  %v272_v25 = vld [vmem:[#allocation7 + $0x2b0] sm:$0xff]  ;;  %v266_v27 = vld [vmem:[#allocation7 + $0x280] sm:$0xff] }
  0x2f   :  { %704 = vmatprep.subr.mxu0 %v869_v0  ;;  %340 = vmatpush1.msra.mxu1 %v277_v20  ;;  %v264_v26 = vld [vmem:[#allocation7 + $0x270] sm:$0xff]  ;;  %v263_v28 = vld [vmem:[#allocation7 + $0x268] sm:$0xff]  ;;  %v265_v29 = vld [vmem:[#allocation7 + $0x278] sm:$0xff] }
  0x30   :  { %705 = vmatpush3.msra.mxu0 %v67_v5  ;;  %341 = vmatprep.subr.mxu1 %v271_v22  ;;  %v257_v30 = vld [vmem:[#allocation7 + $0x238] sm:$0xff]  ;;  %v259_v31 = vld [vmem:[#allocation7 + $0x248] sm:$0xff]  ;;  %v256_v32 = vld [vmem:[#allocation7 + $0x230] sm:$0xff] }
  0x31   :  { %706 = vmatprep.subr.mxu0 %v869_v0  ;;  %342 = vmatpush1.msra.mxu1 %v270_v24  ;;  %v258_v33 = vld [vmem:[#allocation7 + $0x240] sm:$0xff]  ;;  %v252_v35 = vld [vmem:[#allocation7 + $0x210] sm:$0xff]  ;;  %v249_v36 = vld [vmem:[#allocation7 + $0x1f8] sm:$0xff] }
  0x32   :  { %707 = vmatpush3.msra.mxu0 %v66_v6  ;;  %343 = vmatprep.subr.mxu1 %v264_v26  ;;  %v250_v34 = vld [vmem:[#allocation7 + $0x200] sm:$0xff]  ;;  %v251_v37 = vld [vmem:[#allocation7 + $0x208] sm:$0xff]  ;;  %v245_v39 = vld [vmem:[#allocation7 + $0x1d8] sm:$0xff] }
  0x33   :  { %708 = vmatprep.subr.mxu0 %v869_v0  ;;  %344 = vmatpush1.msra.mxu1 %v263_v28  ;;  %v243_v38 = vld [vmem:[#allocation7 + $0x1c8] sm:$0xff]  ;;  %v242_v40 = vld [vmem:[#allocation7 + $0x1c0] sm:$0xff]  ;;  %v244_v41 = vld [vmem:[#allocation7 + $0x1d0] sm:$0xff] }
  0x34   :  { %709 = vmatpush3.msra.mxu0 %v65_v7  ;;  %345 = vmatprep.subr.mxu1 %v257_v30  ;;  %v236_v42 = vld [vmem:[#allocation7 + $0x190] sm:$0xff]  ;;  %v238_v43 = vld [vmem:[#allocation7 + $0x1a0] sm:$0xff]  ;;  %v235_v44 = vld [vmem:[#allocation7 + $0x188] sm:$0xff] }
  0x35   :  { %710 = vmatprep.subr.mxu0 %v869_v0  ;;  %346 = vmatpush1.msra.mxu1 %v256_v32  ;;  %v237_v45 = vld [vmem:[#allocation7 + $0x198] sm:$0xff]  ;;  %v231_v47 = vld [vmem:[#allocation7 + $0x168] sm:$0xff]  ;;  %v228_v48 = vld [vmem:[#allocation7 + $0x150] sm:$0xff] }
  0x36   :  { %711 = vmatpush3.msra.mxu0 %v64_v8  ;;  %347 = vmatprep.subr.mxu1 %v250_v34  ;;  %v229_v46 = vld [vmem:[#allocation7 + $0x158] sm:$0xff]  ;;  %v230_v49 = vld [vmem:[#allocation7 + $0x160] sm:$0xff]  ;;  %v224_v51 = vld [vmem:[#allocation7 + $0x130] sm:$0xff] }
  0x37   :  { %713 = vmatmul.mubr.msk.f32.vlgmr.msra.gmra.mxu0 %vm72_vm1, %v63_v9  ;;  %406 = vmatprep.subr.mxu0 %v294_v11  ;;  %v222_v50 = vld [vmem:[#allocation7 + $0x120] sm:$0xff]  ;;  %v221_v52 = vld [vmem:[#allocation7 + $0x118] sm:$0xff]  ;;  %v223_v53 = vld [vmem:[#allocation7 + $0x128] sm:$0xff] }
  0x38   :  { %470 = vmatprep.mubr.f32.mxu0 %v869_v0  ;;  %407 = vmatpush1.msra.mxu0 %v293_v13  ;;  %v215_v54 = vld [vmem:[#allocation7 + $0xe8] sm:$0xff]  ;;  %v217_v55 = vld [vmem:[#allocation7 + $0xf8] sm:$0xff]  ;;  %v214_v56 = vld [vmem:[#allocation7 + $0xe0] sm:$0xff] }
  0x39   :  { %408 = vmatprep.subr.mxu0 %v287_v15  ;;  %348 = vmatpush1.msra.mxu1 %v249_v36  ;;  %v216_v57 = vld [vmem:[#allocation7 + $0xf0] sm:$0xff]  ;;  %v210_v59 = vld [vmem:[#allocation7 + $0xc0] sm:$0xff]  ;;  %v207_v60 = vld [vmem:[#allocation7 + $0xa8] sm:$0xff] }
  0x3a   :  { %409 = vmatpush1.msra.mxu0 %v286_v17  ;;  %349 = vmatprep.subr.mxu1 %v243_v38  ;;  %v208_v58 = vld [vmem:[#allocation7 + $0xb0] sm:$0xff]  ;;  %v209_v61 = vld [vmem:[#allocation7 + $0xb8] sm:$0xff]  ;;  %v203_v63 = vld [vmem:[#allocation7 + $0x88] sm:$0xff] }
  0x3b   :  { %410 = vmatprep.subr.mxu0 %v280_v19  ;;  %350 = vmatpush1.msra.mxu1 %v242_v40  ;;  %v201_v62 = vld [vmem:[#allocation7 + $0x78] sm:$0xff]  ;;  %v200_v1 = vld [vmem:[#allocation7 + $0x70] sm:$0xff]  ;;  %v202_v2 = vld [vmem:[#allocation7 + $0x80] sm:$0xff] }
  0x3c   :  { %411 = vmatpush1.msra.mxu0 %v279_v21  ;;  %351 = vmatprep.subr.mxu1 %v236_v42  ;;  %v194_v3 = vld [vmem:[#allocation7 + $0x40] sm:$0xff]  ;;  %v196_v4 = vld [vmem:[#allocation7 + $0x50] sm:$0xff]  ;;  %v193_v5 = vld [vmem:[#allocation7 + $0x38] sm:$0xff] }
  0x3d   :  { %412 = vmatprep.subr.mxu0 %v273_v23  ;;  %352 = vmatpush1.msra.mxu1 %v235_v44  ;;  %v195_v6 = vld [vmem:[#allocation7 + $0x48] sm:$0xff]  ;;  %v189_v8 = vld [vmem:[#allocation7 + $0x18] sm:$0xff]  ;;  %v186_v9 = vld [vmem:[#allocation7] sm:$0xff] }
  0x3e   :  { %413 = vmatpush1.msra.mxu0 %v272_v25  ;;  %353 = vmatprep.subr.mxu1 %v229_v46  ;;  %v187_v7 = vld [vmem:[#allocation7 + $0x8] sm:$0xff]  ;;  %v188_v10 = vld [vmem:[#allocation7 + $0x10] sm:$0xff] }
  0x3f   :  { %414 = vmatprep.subr.mxu0 %v266_v27  ;;  %354 = vmatpush1.msra.mxu1 %v228_v48  ;;  %v296_v11 = vld [vmem:[#allocation7 + $0x370] sm:$0xff]  ;;  %v295_v46 = vld [vmem:[#allocation7 + $0x368] sm:$0xff]  ;;  %v289_v48 = vld [vmem:[#allocation7 + $0x338] sm:$0xff] }
  0x40   :  { %415 = vmatpush1.msra.mxu0 %v265_v29  ;;  %355 = vmatprep.subr.mxu1 %v222_v50  ;;  %v290_v50 = vld [vmem:[#allocation7 + $0x340] sm:$0xff] }
  0x41   :  { %416 = vmatprep.subr.mxu0 %v259_v31  ;;  %356 = vmatpush1.msra.mxu1 %v221_v52  ;;  %v171_v31 = vlaneseq  ;;  %v281_v52 = vld [vmem:[#allocation7 + $0x2f8] sm:$0xff] }
  0x42   :  { %417 = vmatpush1.msra.mxu0 %v258_v33  ;;  %357 = vmatprep.subr.mxu1 %v215_v54  ;;  %v163_v33 = vld [vmem:[%s981_s2] sm:$0x1]  ;;  %v275_v54 = vld [vmem:[#allocation7 + $0x2c8] sm:$0xff] }
  0x43   :  { %418 = vmatprep.subr.mxu0 %v252_v35  ;;  %358 = vmatpush1.msra.mxu1 %v214_v56  ;;  %v929_v32 = vshrl.u32 %v171_v31, 7  ;;  %v276_v56 = vld [vmem:[#allocation7 + $0x2d0] sm:$0xff]  ;;  %v298_v31 = vld [vmem:[%s984_s5] sm:$0xff]  ;;  %s871_s5 = smov [#allocation8]  }
  0x44   :  { %419 = vmatpush1.msra.mxu0 %v251_v37  ;;  %359 = vmatprep.subr.mxu1 %v208_v58  ;;  %v167_v37 = vld [vmem:[%s982_s3] sm:$0x1]  ;;  %v267_v58 = vld [vmem:[#allocation7 + $0x288] sm:$0xff]  ;;  %s659_s17 = sshll.u32 %s871_s5, 4  ;;  %s660_s17 = int_to_ptr.vmem [resolvable:$true] %s659_s17 }
  0x45   :  { %420 = vmatprep.subr.mxu0 %v245_v39  ;;  %360 = vmatpush1.msra.mxu1 %v207_v60  ;;  %v935_v34 = vsub.s32 0, %v929_v32  ;;  %v261_v60 = vld [vmem:[#allocation7 + $0x258] sm:$0xff]  ;;  %s836_s18 = scalar_lea.vmem %s660_s17, 896  ;;  %p841_p2 = scmp.lt.s32.totalorder %s660_s17, %s660_s17 }
  0x46   :  { %421 = vmatpush1.msra.mxu0 %v244_v41  ;;  %361 = vmatprep.subr.mxu1 %v201_v62  ;;  %v262_v62 = vld [vmem:[#allocation7 + $0x260] sm:$0xff]  ;;  %p837_p1 = scmp.ne.s32.totalorder %s660_s17, %s836_s18  ;;  %p842_p3 = scmp.lt.s32.totalorder %s836_s18, %s836_s18 }
  0x47   :  { %422 = vmatprep.subr.mxu0 %v238_v43  ;;  %362 = vmatpush1.msra.mxu1 %v200_v1  ;;  %v253_v1 = vld [vmem:[#allocation7 + $0x218] sm:$0xff] }
  0x48   :  { %423 = vmatpush1.msra.mxu0 %v237_v45  ;;  %363 = vmatprep.subr.mxu1 %v194_v3  ;;  %v247_v3 = vld [vmem:[#allocation7 + $0x1e8] sm:$0xff]  ;;  %p843_p4 = por %p842_p3, %p841_p2 }
  0x49   :  { %424 = vmatprep.subr.mxu0 %v231_v47  ;;  %364 = vmatpush1.msra.mxu1 %v193_v5  ;;  %v297_v47 = vld [vmem:[#allocation7 + $0x378] sm:$0xff]  ;;  %v248_v5 = vld [vmem:[#allocation7 + $0x1f0] sm:$0xff] }
  0x4a   :  { %425 = vmatpush1.msra.mxu0 %v230_v49  ;;  %365 = vmatprep.subr.mxu1 %v187_v7  ;;  %v288_v49 = vld [vmem:[#allocation7 + $0x330] sm:$0xff]  ;;  %v239_v7 = vld [vmem:[#allocation7 + $0x1a8] sm:$0xff]  ;;  %p844_p5 = pnand %p843_p4, %p837_p1 }
  0x4b   :  { %426 = vmatprep.subr.mxu0 %v224_v51  ;;  %366 = vmatpush1.msra.mxu1 %v186_v9  ;;  %v282_v51 = vld [vmem:[#allocation7 + $0x300] sm:$0xff]  ;;  %v233_v9 = vld [vmem:[#allocation7 + $0x178] sm:$0xff] }
  0x4c   :  { %427 = vmatpush1.msra.mxu0 %v223_v53  ;;  %477 = vmatprep.subr.mxu1 %v296_v11  ;;  %v283_v53 = vld [vmem:[#allocation7 + $0x308] sm:$0xff]  ;;  %v234_v11 = vld [vmem:[#allocation7 + $0x180] sm:$0xff] }
  0x4d   :  { %428 = vmatprep.subr.mxu0 %v217_v55  ;;  %v274_v55 = vld [vmem:[#allocation7 + $0x2c0] sm:$0xff] }
  0x4e   :  { %429 = vmatpush1.msra.mxu0 %v216_v57  ;;  %v268_v57 = vld [vmem:[#allocation7 + $0x290] sm:$0xff] }
  0x4f   :  { %430 = vmatprep.subr.mxu0 %v210_v59  ;;  %v269_v59 = vld [vmem:[#allocation7 + $0x298] sm:$0xff] }
  0x50   :  { %431 = vmatpush1.msra.mxu0 %v209_v61  ;;  %v260_v61 = vld [vmem:[#allocation7 + $0x250] sm:$0xff] }
  0x51   :  { %432 = vmatprep.subr.mxu0 %v203_v63  ;;  %v254_v63 = vld [vmem:[#allocation7 + $0x220] sm:$0xff] }
  0x52   :  { %433 = vmatpush1.msra.mxu0 %v202_v2  ;;  %v255_v2 = vld [vmem:[#allocation7 + $0x228] sm:$0xff] }
  0x53   :  { %434 = vmatprep.subr.mxu0 %v196_v4  ;;  %v246_v4 = vld [vmem:[#allocation7 + $0x1e0] sm:$0xff] }
  0x54   :  { %435 = vmatpush1.msra.mxu0 %v195_v6  ;;  %v240_v6 = vld [vmem:[#allocation7 + $0x1b0] sm:$0xff] }
  0x55   :  { %436 = vmatprep.subr.mxu0 %v189_v8  ;;  %v241_v8 = vld [vmem:[#allocation7 + $0x1b8] sm:$0xff] }
  0x56   :  { %437 = vmatpush1.msra.mxu0 %v188_v10  ;;  %v232_v10 = vld [vmem:[#allocation7 + $0x170] sm:$0xff] }
  0x57   :  { %715 = vmatprep.subr.mxu0 %v869_v0 }
  0xf7   :  { %v142_v12 = vpop.f32.mrf.mxu0 }
  0xf8   :  { %v146_v13 = vrot.slane %v142_v12, 4 }
  0xf9   :  { %v714_v14 = vpop.f32.mrf.mxu0 }
  0xfa   :  { %v147_v15 = vadd.f32 %v146_v13, %v142_v12  ;;  %v225_v13 = vld [vmem:[#allocation7 + $0x138] sm:$0xff]  ;;  %v227_v14 = vld [vmem:[#allocation7 + $0x148] sm:$0xff] }
  0xfc   :  { %v148_v16 = vrot.slane %v147_v15, 2 }
  0xfe   :  { %v149_v17 = vadd.f32 %v148_v16, %v147_v15  ;;  %v219_v15 = vld [vmem:[#allocation7 + $0x108] sm:$0xff]  ;;  %v218_v16 = vld [vmem:[#allocation7 + $0x100] sm:$0xff] }
 0x100   :  { %v150_v18 = vrot.slane %v149_v17, 1 }
 0x102   :  { %v151_v19 = vadd.f32 %v150_v18, %v149_v17  ;;  %v220_v17 = vld [vmem:[#allocation7 + $0x110] sm:$0xff] }
 0x103   :  { %v212_v18 = vld [vmem:[#allocation7 + $0xd0] sm:$0xff] }
 0x104   :  { %v153_v20 = vmul.f32 0.125, %v151_v19  ;;  %v211_v19 = vld [vmem:[#allocation7 + $0xc8] sm:$0xff] }
 0x106   :  { %v154_v21 = vsub.f32 %v142_v12, %v153_v20 }
 0x108   :  { %v155_v22 = vmul.f32 %v154_v21, %v154_v21  ;;  %v205_v21 = vld [vmem:[#allocation7 + $0x98] sm:$0xff] }
 0x10a   :  { %v156_v23 = vrot.slane %v155_v22, 4 }
 0x10c   :  { %v157_v24 = vadd.f32 %v156_v23, %v155_v22  ;;  %v204_v22 = vld [vmem:[#allocation7 + $0x90] sm:$0xff]  ;;  %v206_v23 = vld [vmem:[#allocation7 + $0xa0] sm:$0xff] }
 0x10e   :  { %v158_v25 = vrot.slane %v157_v24, 2 }
 0x110   :  { %v159_v26 = vadd.f32 %v158_v25, %v157_v24  ;;  %v198_v24 = vld [vmem:[#allocation7 + $0x60] sm:$0xff]  ;;  %v197_v25 = vld [vmem:[#allocation7 + $0x58] sm:$0xff] }
 0x112   :  { %v160_v27 = vrot.slane %v159_v26, 1 }
 0x114   :  { %v161_v28 = vadd.f32 %v160_v27, %v159_v26  ;;  %v199_v26 = vld [vmem:[#allocation7 + $0x68] sm:$0xff] }
 0x115   :  { %v191_v27 = vld [vmem:[#allocation7 + $0x28] sm:$0xff] }
 0x116   :  { %v162_v29 = vmul.f32 0.125, %v161_v28  ;;  %v190_v28 = vld [vmem:[#allocation7 + $0x20] sm:$0xff] }
 0x118   :  { %v164_v30 = vadd.f32 1e-05, %v162_v29  ;;  %v192_v29 = vld [vmem:[#allocation7 + $0x30] sm:$0xff] }
 0x11a   :  { %760 = vrsqrt.f32 %v164_v30  ;;  %v310_v30 = vsub.s32 2, %v929_v32 }
 0x127   :  { %v761_v35 = vpop.eup %760 }
 0x128   :  { %v166_v36 = vmul.f32 %v761_v35, %v163_v33  ;;  %v306_v33 = vsub.s32 1, %v929_v32  ;;  %v314_v35 = vsub.s32 3, %v929_v32 }
 0x12a   :  { %v168_v38 = vmul.f32 %v166_v36, %v153_v20  ;;  %v174_v39 = vrot.slane %v166_v36, %v935_v34  ;;  %v213_v20 = vld [vmem:[#allocation7 + $0xd8] sm:$0xff]  ;;  %v303_v36 = vrot.slane %v298_v31, %v935_v34 }
 0x12c   :  { %v169_v40 = vsub.f32 %v167_v37, %v168_v38  ;;  %v176_v41 = vmul.f32 %v174_v39, %v142_v12  ;;  %v226_v12 = vld [vmem:[#allocation7 + $0x140] sm:$0xff]  ;;  %v311_v37 = vrot.slane %v298_v31, %v310_v30  ;;  %v307_v38 = vrot.slane %v298_v31, %v306_v33 }
 0x12d   :  { %v315_v39 = vrot.slane %v298_v31, %v314_v35 }
 0x12e   :  { %v181_v42 = vrot.slane %v169_v40, %v935_v34 }
 0x130   :  { %v183_v43 = vadd.f32 %v181_v42, %v176_v41 }
 0x132   :  { %v184_v44 = vmul.f32 0.2, %v183_v43 }
 0x134   :  { %v942_v45 = vmax.f32 %v183_v43, %v184_v44 }
 0x136   :  { %400 = vmatmul.mubr.f32.vlgmr.msra.gmra.mxu1 %v942_v45  ;;  %471 = vmatmul.mubr.f32.vlgmr.msra.gmra.mxu0 %v942_v45 }
 0x137   :  { %478 = vmatpush1.msra.mxu1 %v295_v46  ;;  %716 = vmatpush3.msra.mxu0 %v297_v47 }
 0x138   :  { %479 = vmatprep.subr.mxu1 %v289_v48  ;;  %717 = vmatprep.subr.mxu0 %v869_v0 }
 0x139   :  { %480 = vmatpush1.msra.mxu1 %v288_v49  ;;  %718 = vmatpush3.msra.mxu0 %v290_v50 }
 0x13a   :  { %481 = vmatprep.subr.mxu1 %v282_v51  ;;  %719 = vmatprep.subr.mxu0 %v869_v0 }
 0x13b   :  { %482 = vmatpush1.msra.mxu1 %v281_v52  ;;  %720 = vmatpush3.msra.mxu0 %v283_v53 }
 0x13c   :  { %483 = vmatprep.subr.mxu1 %v275_v54  ;;  %721 = vmatprep.subr.mxu0 %v869_v0 }
 0x13d   :  { %484 = vmatpush1.msra.mxu1 %v274_v55  ;;  %722 = vmatpush3.msra.mxu0 %v276_v56 }
 0x13e   :  { %485 = vmatprep.subr.mxu1 %v268_v57  ;;  %723 = vmatprep.subr.mxu0 %v869_v0 }
 0x13f   :  { %486 = vmatpush1.msra.mxu1 %v267_v58  ;;  %724 = vmatpush3.msra.mxu0 %v269_v59 }
 0x140   :  { %487 = vmatprep.subr.mxu1 %v261_v60  ;;  %725 = vmatprep.subr.mxu0 %v869_v0 }
 0x141   :  { %488 = vmatpush1.msra.mxu1 %v260_v61  ;;  %726 = vmatpush3.msra.mxu0 %v262_v62  ;;  %v318_v62 = vsub.s32 4, %v929_v32 }
 0x142   :  { %489 = vmatprep.subr.mxu1 %v254_v63  ;;  %727 = vmatprep.subr.mxu0 %v869_v0  ;;  %v326_v63 = vsub.s32 6, %v929_v32 }
 0x143   :  { %490 = vmatpush1.msra.mxu1 %v253_v1  ;;  %728 = vmatpush3.msra.mxu0 %v255_v2  ;;  %v322_v1 = vsub.s32 5, %v929_v32  ;;  %v319_v2 = vrot.slane %v298_v31, %v318_v62 }
 0x144   :  { %491 = vmatprep.subr.mxu1 %v247_v3  ;;  %729 = vmatprep.subr.mxu0 %v869_v0  ;;  %v327_v3 = vrot.slane %v298_v31, %v326_v63 }
 0x145   :  { %492 = vmatpush1.msra.mxu1 %v246_v4  ;;  %730 = vmatpush3.msra.mxu0 %v248_v5  ;;  %v323_v4 = vrot.slane %v298_v31, %v322_v1 }
 0x146   :  { %493 = vmatprep.subr.mxu1 %v240_v6  ;;  %731 = vmatprep.subr.mxu0 %v869_v0 }
 0x147   :  { %494 = vmatpush1.msra.mxu1 %v239_v7  ;;  %732 = vmatpush3.msra.mxu0 %v241_v8 }
 0x148   :  { %495 = vmatprep.subr.mxu1 %v233_v9  ;;  %733 = vmatprep.subr.mxu0 %v869_v0 }
 0x149   :  { %496 = vmatpush1.msra.mxu1 %v232_v10  ;;  %734 = vmatpush3.msra.mxu0 %v234_v11 }
 0x14a   :  { %497 = vmatprep.subr.mxu1 %v226_v12  ;;  %735 = vmatprep.subr.mxu0 %v869_v0 }
 0x14b   :  { %498 = vmatpush1.msra.mxu1 %v225_v13  ;;  %736 = vmatpush3.msra.mxu0 %v227_v14 }
 0x14c   :  { %499 = vmatprep.subr.mxu1 %v219_v15  ;;  %737 = vmatprep.subr.mxu0 %v869_v0 }
 0x14d   :  { %500 = vmatpush1.msra.mxu1 %v218_v16  ;;  %738 = vmatpush3.msra.mxu0 %v220_v17 }
 0x14e   :  { %501 = vmatprep.subr.mxu1 %v212_v18  ;;  %739 = vmatprep.subr.mxu0 %v869_v0 }
 0x14f   :  { %502 = vmatpush1.msra.mxu1 %v211_v19  ;;  %740 = vmatpush3.msra.mxu0 %v213_v20 }
 0x150   :  { %503 = vmatprep.subr.mxu1 %v205_v21  ;;  %741 = vmatprep.subr.mxu0 %v869_v0 }
 0x151   :  { %504 = vmatpush1.msra.mxu1 %v204_v22  ;;  %742 = vmatpush3.msra.mxu0 %v206_v23 }
 0x152   :  { %505 = vmatprep.subr.mxu1 %v198_v24  ;;  %743 = vmatprep.subr.mxu0 %v869_v0 }
 0x153   :  { %506 = vmatpush1.msra.mxu1 %v197_v25  ;;  %744 = vmatpush3.msra.mxu0 %v199_v26 }
 0x154   :  { %507 = vmatprep.subr.mxu1 %v191_v27  ;;  %745 = vmatprep.subr.mxu0 %v869_v0 }
 0x155   :  { %508 = vmatpush1.msra.mxu1 %v190_v28  ;;  %541 = vmatprep.mubr.f32.mxu1 %v869_v0 }
 0x156   :  { %746 = vmatpush3.msra.mxu0 %v192_v29  ;;  %747 = vmatprep.mubr.msk.f32.mxu0 %vm870_vm0, %v869_v0 }
 0x157   :  { %542 = vmatmul.mubr.f32.vlgmr.msra.gmra.mxu1 %v942_v45  ;;  %748 = vmatmul.mubr.f32.vlgmr.msra.gmra.mxu0 %v942_v45 }
 0x1f6   :  { %v401_v0 = vpop.f32.mrf.mxu1  ;;  %v472_v40 = vpop.f32.mrf.mxu0 }
 0x1f7   :  { %v402_v41 = vadd.f32 %v401_v0, %v303_v36  ;;  %v473_v42 = vadd.f32 %v472_v40, %v311_v37 }
 0x1f8   :  { %v403_v43 = vpop.f32.mrf.mxu1  ;;  %v474_v44 = vpop.f32.mrf.mxu0 }
 0x1f9   :  { %v618_v45 = vmul.f32 0.5, %v402_v41  ;;  %v620_v46 = vmul.f32 0.5, %v473_v42  ;;  %v404_v47 = vadd.f32 %v403_v43, %v307_v38  ;;  %v475_v48 = vadd.f32 %v474_v44, %v315_v39 }
 0x1fb   :  { %762 = vtanh.f32 %v618_v45  ;;  %v619_v49 = vmul.f32 0.5, %v404_v47  ;;  %v621_v50 = vmul.f32 0.5, %v475_v48 }
 0x1fc   :  { %764 = vtanh.f32 %v620_v46 }
 0x1fd   :  { %766 = vtanh.f32 %v619_v49 }
 0x1fe   :  { %768 = vtanh.f32 %v621_v50 }
 0x208   :  { %v763_v34 = vpop.eup %762 }
 0x209   :  { %v765_v51 = vpop.eup %764  ;;  %v632_v52 = vmul.f32 0.5, %v763_v34 }
 0x20a   :  { %v767_v53 = vpop.eup %766  ;;  %v634_v54 = vmul.f32 0.5, %v765_v51 }
 0x20b   :  { %v769_v55 = vpop.eup %768  ;;  %v639_v56 = vadd.f32 0.5, %v632_v52  ;;  %v633_v57 = vmul.f32 0.5, %v767_v53 }
 0x20c   :  { %v641_v58 = vadd.f32 0.5, %v634_v54  ;;  %v635_v59 = vmul.f32 0.5, %v769_v55 }
 0x20d   :  { %646 = vst [vmem:[#allocation8] sm:$0xff] %v639_v56  ;;  %v640_v60 = vadd.f32 0.5, %v633_v57 }
 0x20e   :  { %648 = vst [vmem:[#allocation8 + $0x10] sm:$0xff] %v641_v58  ;;  %v642_v61 = vadd.f32 0.5, %v635_v59 }
 0x20f   :  { %647 = vst [vmem:[#allocation8 + $0x8] sm:$0xff] %v640_v60 }
 0x210   :  { %649 = vst [vmem:[#allocation8 + $0x18] sm:$0xff] %v642_v61 }
 0x217   :  { %v543_v5 = vpop.f32.mrf.mxu1  ;;  %v614_v6 = vpop.f32.mrf.mxu0 }
 0x218   :  { %v544_v7 = vadd.f32 %v543_v5, %v319_v2  ;;  %v615_v8 = vadd.f32 %v614_v6, %v327_v3 }
 0x219   :  { %v545_v9 = vpop.f32.mrf.mxu1  ;;  %v749_v10 = vpop.f32.mrf.mxu0 }
 0x21a   :  { %v622_v11 = vmul.f32 0.5, %v544_v7  ;;  %v624_v12 = vmul.f32 0.5, %v615_v8  ;;  %v546_v13 = vadd.f32 %v545_v9, %v323_v4 }
 0x21c   :  { %770 = vtanh.f32 %v622_v11  ;;  %v623_v14 = vmul.f32 0.5, %v546_v13 }
 0x21d   :  { %772 = vtanh.f32 %v624_v12 }
 0x21e   :  { %774 = vtanh.f32 %v623_v14 }
 0x229   :  { %v771_v15 = vpop.eup %770 }
 0x22a   :  { %v773_v16 = vpop.eup %772  ;;  %v636_v17 = vmul.f32 0.5, %v771_v15 }
 0x22b   :  { %v775_v32 = vpop.eup %774  ;;  %v638_v18 = vmul.f32 0.5, %v773_v16 }
 0x22c   :  { %v643_v19 = vadd.f32 0.5, %v636_v17  ;;  %v637_v20 = vmul.f32 0.5, %v775_v32 }
 0x22d   :  { %v645_v21 = vadd.f32 0.5, %v638_v18 }
 0x22e   :  { %650 = vst [vmem:[#allocation8 + $0x20] sm:$0xff] %v643_v19  ;;  %v644_v22 = vadd.f32 0.5, %v637_v20 }
 0x22f   :  { %652 = vst [vmem:[#allocation8 + $0x30] sm:$0xff] %v645_v21 }
 0x230   :  { %651 = vst [vmem:[#allocation8 + $0x28] sm:$0xff] %v644_v22 }
 0x231   :  { %847 = shalt.err (!%p844_p5)
}
 0x232   :  { %662 = dma.vmem_to_hbm [thread:$0]  %s660_s17, 896, %s985_s6, [#allocation4]  }
 0x233   :  { %860 = dma.done.wait [#allocation4], 896  }
 0x234   :  { %861 = vsyncadd [#allocation4], 4294966400 }
 0x235   :  { %666 = vsyncpa [#allocation3], 1 }
 0x236   :  { %667 = vsyncpa [#allocation6], 1 }
 0x237   :  { %668 = vsyncpa [#allocation4], 1 }

</bundles_post_ra>
